<compile_context>
chip_gen: v5e
topology: v5e:2x2
jax: 0.10.0
libtpu: 0.0.40
codegen_flags: <defaults>
</compile_context>

<pallas_src>
import jax
import jax.numpy as jnp
from jax.experimental import pallas as pl
from jax.experimental.pallas import tpu as pltpu

_LANES = 128

# 64K lanes per block -> 2 MiB physical VMEM per f32 buffer (sublane-padded to
# 8 rows).  With input + output double-buffered this is 8 MiB of scoped VMEM,
# safe on every generation (v7x scoped default is 32 MiB).
_MAX_TILE_LANES = 64 * 1024

# Below this element count the pallas_call custom-call overhead dominates a
# memory-bound sigmoid; a single fused XLA elementwise op is strictly faster.
_PALLAS_MIN_N = 64 * 1024


def _round_up(x: int, m: int) -> int:
    return ((x + m - 1) // m) * m


def _sigmoid_kernel(p_ref, o_ref):
    # p_ref / o_ref: (1, TILE) f32 tile of the policy-logit parameter.
    # jax.nn.sigmoid lowers to the stable logistic; exp/recip run on the EUP
    # and are fully hidden under the HBM DMA for this mem-bound kernel.
    o_ref[...] = jax.nn.sigmoid(p_ref[...])


def _policy_org_forward_pallas(out_param):
    n = out_param.shape[1]

    # Lane-dense (1, TILE) tiling directly on the original array: no pad, no
    # reshape, no slice.  The boundary block (when n % TILE != 0) is padded by
    # Pallas on read; the corresponding out-of-bounds writes are dropped, so
    # the result is exact even though the tail values read are unspecified.
    tile = min(_round_up(n, _LANES), _MAX_TILE_LANES)
    grid = (pl.cdiv(n, tile),)

    cost = pl.CostEstimate(
        flops=2 * n,            # add + reciprocal per element
        transcendentals=n,      # exp per element
        bytes_accessed=2 * 4 * n,
    )

    return pl.pallas_call(
        _sigmoid_kernel,
        out_shape=jax.ShapeDtypeStruct((1, n), out_param.dtype),
        grid=grid,
        in_specs=[pl.BlockSpec((1, tile), lambda i: (0, i))],
        out_specs=pl.BlockSpec((1, tile), lambda i: (0, i)),
        compiler_params=pltpu.CompilerParams(
            dimension_semantics=("parallel",),
        ),
        cost_estimate=cost,
    )(out_param)


def policy_org_forward(xs_flt, out_param, *, force_pallas: bool = False):
    """Pallas equivalent of PolicyORG.forward.

    `xs_flt` is accepted (and type-checked) for parity with the PyTorch module
    but is otherwise unused — the module returns sigmoid(out_param) regardless
    of the input.
    """
    assert isinstance(xs_flt, jax.Array)  # mirrors `assert isinstance(xs_flt, TEN)`
    assert out_param.ndim == 2 and out_param.shape[0] == 1
    n = out_param.shape[1]

    # Small-n fast path: one fused XLA elementwise op beats any custom call.
    if not force_pallas and n < _PALLAS_MIN_N:
        return jax.nn.sigmoid(out_param)

    return _policy_org_forward_pallas(out_param)


def policy_org_auto_regressive(xs_flt, out_param, *, force_pallas: bool = False):
    # PolicyORG.auto_regressive just calls forward.
    return policy_org_forward(xs_flt, out_param, force_pallas=force_pallas)


def init_policy_org_params(key, num_nodes):
    # Matches: nn.Parameter(th.rand((1, num_nodes)) * 0.02 + 0.49)
    return jax.random.uniform(key, (1, num_nodes), jnp.float32) * 0.02 + 0.49


def policy_org_reference(xs_flt, out_param):
    # Pure-JAX reference (input ignored, exactly as in the PyTorch module).
    return jax.nn.sigmoid(out_param)


if __name__ == "__main__":
    num_nodes = 300   # num_bits (graph nodes) — typical L2A size
    batch = 4

    key = jax.random.PRNGKey(0)
    k_x, k_p = jax.random.split(key)
    xs_flt = jax.random.uniform(k_x, (batch, num_nodes), jnp.float32)  # unused by forward
    out_param = init_policy_org_params(k_p, num_nodes)

    # Exercise the actual Pallas kernel (force past the small-n fast path).
    y_kernel = policy_org_forward(xs_flt, out_param, force_pallas=True)
    y_kernel = jax.block_until_ready(y_kernel)

    # Default public path (fast path at this size).
    y_default = jax.block_until_ready(policy_org_forward(xs_flt, out_param))

    ref = policy_org_reference(xs_flt, out_param)
    assert y_kernel.shape == (1, num_nodes)
    assert jnp.allclose(y_kernel, ref, atol=1e-6, rtol=1e-6), "pallas path mismatch"
    assert jnp.allclose(y_default, ref, atol=1e-6, rtol=1e-6), "fast path mismatch"

    print("KERNEL_OK")
</pallas_src>

<mosaic_0001>
module attributes {stable_mosaic.version = 11 : i64} {
  func.func @_sigmoid_kernel(%arg0: i32, %arg1: memref<1x384xf32, #tpu.memory_space<vmem>>, %arg2: memref<1x384xf32, #tpu.memory_space<vmem>>) attributes {dimension_semantics = [#tpu.dimension_semantics<parallel>], iteration_bounds = array<i64: 1>, scalar_prefetch = 0 : i64, scratch_operands = 0 : i64, tpu.core_type = #tpu.core_type<tc>, window_params = [{transform_indices = @transform_0, window_bounds = array<i64: 1, 384>}, {transform_indices = @transform_1, window_bounds = array<i64: 1, 384>}]} {
    %c0 = arith.constant 0 : index
    %c0_0 = arith.constant 0 : index
    %0 = vector.load %arg1[%c0, %c0_0] : memref<1x384xf32, #tpu.memory_space<vmem>>, vector<1x384xf32>
    %1 = arith.negf %0 : vector<1x384xf32>
    %2 = math.exp %1 : vector<1x384xf32>
    %cst = arith.constant 1.000000e+00 : f32
    %3 = vector.broadcast %cst : f32 to vector<1x384xf32>
    %4 = arith.addf %3, %2 : vector<1x384xf32>
    %5 = arith.divf %3, %4 : vector<1x384xf32>
    %c0_1 = arith.constant 0 : index
    %c0_2 = arith.constant 0 : index
    %6 = vector.load %arg2[%c0_1, %c0_2] : memref<1x384xf32, #tpu.memory_space<vmem>>, vector<1x384xf32>
    tpu.vector_store %arg2[%c0_1, %c0_2], %5 {strides = array<i32>} : memref<1x384xf32, #tpu.memory_space<vmem>>, vector<1x384xf32>,
    return
  }
  func.func @transform_0(%arg0: i32) -> (i32, i32) {
    %c0_i32 = arith.constant 0 : i32
    %c0_i32_0 = arith.constant 0 : i32
    return %c0_i32, %arg0 : i32, i32
  }
  func.func @transform_1(%arg0: i32) -> (i32, i32) {
    %c0_i32 = arith.constant 0 : i32
    %c0_i32_0 = arith.constant 0 : i32
    return %c0_i32, %arg0 : i32, i32
  }
}

</mosaic_0001>

<bundles_post_ra>
// kernel: tpu_custom_call.1
= control target key start
LH: loop header
LB: loop body
LE: loop exit
PB: predicated region body
PF: predicated region fallthrough
CT: control target
= control target key end

     0   :  { %6 = vsyncpa [#allocation3], 0  ;;  %s142_s0 = inlined_call_operand.hbm [shape: f32[1,300], index: 0, kind: input, shape index: {}]   ;;  %s143_s1 = inlined_call_operand.hbm [shape: f32[1,300], index: 1, kind: output, shape index: {}]  }
   0x1   :  { %7 = vsyncpa [#allocation4], 0  ;;  %s13_s8 = sshll.u32 %s142_s0, 4  ;;  %s124_s9 = smov [#allocation2]   ;;  %s14_s8 = int_to_ptr.hbm [resolvable:$true] %s13_s8 }
   0x2   :  { %s15_s10 = sshll.u32 %s124_s9, 4  ;;  %s16_s10 = int_to_ptr.vmem [resolvable:$true] %s15_s10 }
   0x3   :  { %18 = dma.hbm_to_vmem [thread:$0]  %s14_s8, 48, %s16_s10, [#allocation3]  }
   0x4   :  { %120 = dma.done.wait [#allocation3], 48  }
   0x5   :  { %121 = vsyncadd [#allocation3], 4294967248  ;;  %v23_v0 = vld [vmem:[#allocation2] sm:$0x7]  ;;  %v43_v9 = vlaneseq  ;;  %s125_s0 = smov [#allocation5]   ;;  %s55_s14 = sshll.u32 %s143_s1, 4  ;;  %s56_s14 = int_to_ptr.hbm [resolvable:$true] %s55_s14 }
   0x6   :  { %v65_v1 = vmul.f32 -1.442695, %v23_v0  ;;  %s53_s11 = sshll.u32 %s125_s0, 4  ;;  %s54_s11 = int_to_ptr.vmem [resolvable:$true] %s53_s11 }
   0x7   :  { %vm45_vm4 = vcmp.lt.s32.totalorder %v43_v9, 384 }
   0x8   :  { %68 = vpow2.f32 %v65_v1 }
   0xe   :  { %v69_v2 = vpop.eup %68 }
   0xf   :  { %v27_v3 = vadd.f32 1.0, %v69_v2 }
  0x11   :  { %70 = vrcp.f32 %v27_v3  ;;  %v39_v6 = vand.u32 2147483648, %v27_v3  ;;  %vm33_vm0 = vweird.f32 %v27_v3  ;;  %v37_v8 = vand.u32 2147483647, %v27_v3 }
  0x13   :  { %v40_v11 = vor.u32 1.1754944e-38, %v39_v6  ;;  %vm38_vm3 = vcmp.eq.f32.partialorder %v37_v8, 8.507059e+37 }
  0x17   :  { %v71_v4 = vpop.eup %70 }
  0x18   :  { %v29_v5 = vmul.f32 %v71_v4, %v27_v3  ;;  %vm34_vm1 = vweird.f32 %v71_v4 }
  0x19   :  { %vm35_vm2 = vmor %vm33_vm0, %vm34_vm1 }
  0x1a   :  { %v30_v7 = vsub.f32 1.0, %v29_v5 }
  0x1c   :  { %v31_v10 = vmul.f32 %v71_v4, %v30_v7 }
  0x1e   :  { %v32_v12 = vadd.f32 %v71_v4, %v31_v10 }
  0x20   :  { %v36_v13 = vsel %vm35_vm2, %v71_v4, %v32_v12 }
  0x21   :  { %v41_v14 = vsel %vm38_vm3, %v40_v11, %v36_v13 }
  0x22   :  { %47 = vst.msk [vmem:[#allocation5] sm:$0x7] %vm45_vm4, %v41_v14 }
  0x23   :  { %58 = dma.vmem_to_hbm [thread:$0]  %s54_s11, 48, %s56_s14, [#allocation4]  }
  0x24   :  { %122 = dma.done.wait [#allocation4], 48  }
  0x25   :  { %123 = vsyncadd [#allocation4], 4294967248 }
  0x26   :  { %63 = vsyncpa [#allocation3], 1 }
  0x27   :  { %64 = vsyncpa [#allocation4], 1 }

</bundles_post_ra>
